<compile_context>
chip_gen: v6e
topology: v6e:2x2x1
jax: 0.10.0
libtpu: 0.0.40
codegen_flags: <defaults>
</compile_context>

<pallas_src>
import jax
import jax.numpy as jnp
from jax.experimental import pallas as pl
from jax.experimental.pallas import tpu as pltpu

_LANE = 128
_SUBLANE = 8


def _round_up(x, m):
    return ((x + m - 1) // m) * m


def _mlp_kernel(x_ref, w1_ref, b1_ref, w2_ref, b2_ref, w3_ref, b3_ref, o_ref):
    """One batch tile: (TB, K) @ (K, H) -> relu -> (H, H) -> relu -> (H, N)."""
    cdt = w1_ref.dtype                 # matmul operand dtype (f32 or bf16)
    num_out = o_ref.shape[-1]          # true (unpadded) output width

    x = x_ref[...].astype(cdt)
    # MXU accumulates in f32; bias add + ReLU run in f32 on the VPU.
    h1 = jnp.dot(x, w1_ref[...], preferred_element_type=jnp.float32) + b1_ref[...]
    h1 = jnp.maximum(h1, 0.0)

    h2 = jnp.dot(h1.astype(cdt), w2_ref[...],
                 preferred_element_type=jnp.float32) + b2_ref[...]
    h2 = jnp.maximum(h2, 0.0)

    out = jnp.dot(h2.astype(cdt), w3_ref[...],
                  preferred_element_type=jnp.float32) + b3_ref[...]
    # w3/b3 are lane-padded (VMEM-only) for an MXU-aligned matmul; store only
    # the real num_out lanes -> lean HBM writeback (masked vst is the cheap side
    # of that trade on a mem-bound kernel).
    o_ref[...] = out[:, :num_out].astype(o_ref.dtype)


def prepare_params(params, *, compute_dtype=jnp.float32):
    """Pad/cast parameters ONCE, outside the per-call fast path.

    Hidden dims are zero-padded to multiples of 128 (lane-dense matmuls and
    VMEM-resident weights).  num_in and num_out stay unpadded at the HBM level;
    only w3/b3's output dim is lane-padded (kernel stores the first num_out
    lanes).  Zero padding is semantics-preserving through ReLU.
    """
    w1, b1 = params["w1"], params["b1"]
    w2, b2 = params["w2"], params["b2"]
    w3, b3 = params["w3"], params["b3"]

    num_in, hidden = w1.shape
    num_out = w3.shape[1]
    H = _round_up(hidden, _LANE)
    N = _round_up(num_out, _LANE)

    def pad_w(w, rows, cols):
        w = jnp.asarray(w)
        if w.shape == (rows, cols) and w.dtype == compute_dtype:
            return w                                    # already aligned: no extra pass
        out = jnp.zeros((rows, cols), compute_dtype)
        return out.at[: w.shape[0], : w.shape[1]].set(w.astype(compute_dtype))

    def pad_b(b, cols):
        b = jnp.asarray(b, jnp.float32).reshape(1, -1)  # bias add stays f32 (v5e VPU)
        if b.shape[1] == cols:
            return b
        out = jnp.zeros((1, cols), jnp.float32)
        return out.at[:, : b.shape[1]].set(b)

    return {
        "w1": pad_w(w1, num_in, H), "b1": pad_b(b1, H),
        "w2": pad_w(w2, H, H),      "b2": pad_b(b2, H),
        "w3": pad_w(w3, H, N),      "b3": pad_b(b3, N),
        "num_out": num_out,
    }


def _pick_tb(batch, batch_tile, sublane):
    """Sublane-aligned batch tile; >=2 grid steps when possible (v7x megacore)."""
    if batch < sublane:
        return batch                     # block == full batch extent (allowed)
    if batch >= 2 * sublane:
        tb = _round_up(pl.cdiv(batch, 2), sublane)
    else:
        tb = sublane
    tb = min(batch_tile, tb)
    return max(sublane, (tb // sublane) * sublane)


def two_layer_fc_forward(x, prepared, *, out_dtype=None, batch_tile=1024):
    """Forward pass.  x: (B, num_in); `prepared` from prepare_params() (reused)."""
    w1, b1 = prepared["w1"], prepared["b1"]
    w2, b2 = prepared["w2"], prepared["b2"]
    w3, b3 = prepared["w3"], prepared["b3"]
    num_out = prepared["num_out"]

    B, num_in = x.shape
    assert num_in == w1.shape[0], "x feature dim does not match prepared params"
    H = w1.shape[1]
    N = w3.shape[1]
    out_dtype = x.dtype if out_dtype is None else out_dtype

    # Sub-32-bit x / out pack 2 rows per sublane -> keep tiles 16-row aligned.
    sub = _SUBLANE
    if jnp.dtype(x.dtype).itemsize < 4 or jnp.dtype(out_dtype).itemsize < 4:
        sub = 2 * _SUBLANE
    TB = _pick_tb(B, batch_tile, sub)
    grid = (pl.cdiv(B, TB),)          # ragged trailing block: output writes masked

    const = lambda i: (0, 0)          # weights/biases: VMEM-resident across tiles

    # NOTE: if hidden_dim is ever scaled up (e.g. 4096 bf16 on v7x's 64 MiB VMEM),
    # add pipeline_mode=pl.Buffered(1) on the constant weight specs and set an
    # explicit vmem_limit_bytes; at these sizes it is noise.
    return pl.pallas_call(
        _mlp_kernel,
        out_shape=jax.ShapeDtypeStruct((B, num_out), out_dtype),
        grid_spec=pltpu.PrefetchScalarGridSpec(
            num_scalar_prefetch=0,
            grid=grid,
            in_specs=[
                pl.BlockSpec((TB, num_in), lambda i: (i, 0)),  # x tile (pipelined)
                pl.BlockSpec((num_in, H), const),              # w1
                pl.BlockSpec((1, H), const),                   # b1
                pl.BlockSpec((H, H), const),                   # w2
                pl.BlockSpec((1, H), const),                   # b2
                pl.BlockSpec((H, N), const),                   # w3 (lane-padded)
                pl.BlockSpec((1, N), const),                   # b3 (lane-padded)
            ],
            out_specs=pl.BlockSpec((TB, num_out), lambda i: (i, 0)),
        ),
        compiler_params=pltpu.CompilerParams(
            dimension_semantics=("parallel",),   # batch axis -> megacore-shardable
        ),
    )(x, w1, b1, w2, b2, w3, b3)


def init_params(key, num_in, num_out, hidden_dim):
    """Deterministic init mimicking torch.nn.Linear default (+/- 1/sqrt(fan_in))."""
    ks = jax.random.split(key, 6)

    def linear(kw, kb, fan_in, fan_out):
        bound = 1.0 / jnp.sqrt(jnp.float32(fan_in))
        w = jax.random.uniform(kw, (fan_in, fan_out), jnp.float32, -bound, bound)
        b = jax.random.uniform(kb, (1, fan_out), jnp.float32, -bound, bound)
        return w, b

    w1, b1 = linear(ks[0], ks[1], num_in, hidden_dim)
    w2, b2 = linear(ks[2], ks[3], hidden_dim, hidden_dim)
    w3, b3 = linear(ks[4], ks[5], hidden_dim, num_out)
    return {"w1": w1, "b1": b1, "w2": w2, "b2": b2, "w3": w3, "b3": b3}


def _ref(x, p):
    h = jnp.maximum(x @ p["w1"] + p["b1"], 0.0)
    h = jnp.maximum(h @ p["w2"] + p["b2"], 0.0)
    return h @ p["w3"] + p["b3"]


if __name__ == "__main__":
    hidden_dim = 64
    num_in = 8    # observation dim (simple_adversary)
    num_out = 5   # action dim

    key = jax.random.PRNGKey(0)
    k_x, k_x2, k_p = jax.random.split(key, 3)
    params = init_params(k_p, num_in, num_out, hidden_dim)

    prepared_f32 = prepare_params(params, compute_dtype=jnp.float32)
    prepared_bf16 = prepare_params(params, compute_dtype=jnp.bfloat16)

    # --- toy production batch (f32, bit-comparable to the pure-JAX reference) ---
    x_small = jax.random.normal(k_x, (4, num_in), jnp.float32)
    ref_small = _ref(x_small, params)
    out = jax.block_until_ready(two_layer_fc_forward(x_small, prepared_f32))
    assert out.shape == (4, num_out) and out.dtype == jnp.float32
    assert jnp.allclose(out, ref_small, atol=1e-5, rtol=1e-5)

    # --- larger ragged batch: multi-tile grid + masked trailing block ---
    x_big = jax.random.normal(k_x2, (100, num_in), jnp.float32)
    ref_big = _ref(x_big, params)
    out = jax.block_until_ready(two_layer_fc_forward(x_big, prepared_f32))
    assert out.shape == (100, num_out) and out.dtype == jnp.float32
    assert jnp.allclose(out, ref_big, atol=1e-5, rtol=1e-5)

    # --- bf16 fast path: bf16 x / weights / output, f32 MXU accumulation ---
    out = jax.block_until_ready(
        two_layer_fc_forward(x_small.astype(jnp.bfloat16), prepared_bf16,
                             out_dtype=jnp.bfloat16))
    assert out.shape == (4, num_out) and out.dtype == jnp.bfloat16
    assert jnp.allclose(out.astype(jnp.float32), ref_small, atol=3e-2, rtol=3e-2)

    out = jax.block_until_ready(
        two_layer_fc_forward(x_big.astype(jnp.bfloat16), prepared_bf16,
                             out_dtype=jnp.bfloat16))
    assert out.shape == (100, num_out) and out.dtype == jnp.bfloat16
    assert jnp.allclose(out.astype(jnp.float32), ref_big, atol=3e-2, rtol=3e-2)

    print("KERNEL_OK")
</pallas_src>

<mosaic_0001>
module attributes {stable_mosaic.version = 11 : i64} {
  func.func @_mlp_kernel(%arg0: i32, %arg1: memref<4x8xf32, #tpu.memory_space<vmem>>, %arg2: memref<8x128xf32, #tpu.memory_space<vmem>>, %arg3: memref<1x128xf32, #tpu.memory_space<vmem>>, %arg4: memref<128x128xf32, #tpu.memory_space<vmem>>, %arg5: memref<1x128xf32, #tpu.memory_space<vmem>>, %arg6: memref<128x128xf32, #tpu.memory_space<vmem>>, %arg7: memref<1x128xf32, #tpu.memory_space<vmem>>, %arg8: memref<4x5xf32, #tpu.memory_space<vmem>>) attributes {dimension_semantics = [#tpu.dimension_semantics<parallel>], iteration_bounds = array<i64: 1>, scalar_prefetch = 0 : i64, scratch_operands = 0 : i64, tpu.core_type = #tpu.core_type<tc>, window_params = [{transform_indices = @transform_0, window_bounds = array<i64: 4, 8>}, {pipeline_mode = #tpu.pipeline_mode<synchronous>, transform_indices = @transform_1, window_bounds = array<i64: 8, 128>}, {pipeline_mode = #tpu.pipeline_mode<synchronous>, transform_indices = @transform_2, window_bounds = array<i64: 1, 128>}, {pipeline_mode = #tpu.pipeline_mode<synchronous>, transform_indices = @transform_3, window_bounds = array<i64: 128, 128>}, {pipeline_mode = #tpu.pipeline_mode<synchronous>, transform_indices = @transform_4, window_bounds = array<i64: 1, 128>}, {pipeline_mode = #tpu.pipeline_mode<synchronous>, transform_indices = @transform_5, window_bounds = array<i64: 128, 128>}, {pipeline_mode = #tpu.pipeline_mode<synchronous>, transform_indices = @transform_6, window_bounds = array<i64: 1, 128>}, {transform_indices = @transform_7, window_bounds = array<i64: 4, 5>}]} {
    %c0 = arith.constant 0 : index
    %c0_0 = arith.constant 0 : index
    %0 = vector.load %arg1[%c0, %c0_0] : memref<4x8xf32, #tpu.memory_space<vmem>>, vector<4x8xf32>
    %c0_1 = arith.constant 0 : index
    %c0_2 = arith.constant 0 : index
    %1 = vector.load %arg2[%c0_1, %c0_2] : memref<8x128xf32, #tpu.memory_space<vmem>>, vector<8x128xf32>
    %cst = arith.constant dense<0.000000e+00> : vector<4x128xf32>
    %2 = tpu.matmul %0, %1, %cst {dimension_numbers = #tpu.dot_dimension_numbers<[1], [0], [0], [1], [0, 0, 1, 1], [], []>} : vector<4x8xf32>, vector<8x128xf32>, vector<4x128xf32> -> vector<4x128xf32>
    %c0_3 = arith.constant 0 : index
    %c0_4 = arith.constant 0 : index
    %3 = vector.load %arg3[%c0_3, %c0_4] : memref<1x128xf32, #tpu.memory_space<vmem>>, vector<1x128xf32>
    %4 = vector.broadcast %3 : vector<1x128xf32> to vector<4x128xf32>
    %5 = arith.addf %2, %4 : vector<4x128xf32>
    %cst_5 = arith.constant 0.000000e+00 : f32
    %6 = vector.broadcast %cst_5 : f32 to vector<4x128xf32>
    %7 = arith.maximumf %5, %6 : vector<4x128xf32>
    %c0_6 = arith.constant 0 : index
    %c0_7 = arith.constant 0 : index
    %8 = vector.load %arg4[%c0_6, %c0_7] : memref<128x128xf32, #tpu.memory_space<vmem>>, vector<128x128xf32>
    %cst_8 = arith.constant dense<0.000000e+00> : vector<4x128xf32>
    %9 = tpu.matmul %7, %8, %cst_8 {dimension_numbers = #tpu.dot_dimension_numbers<[1], [0], [0], [1], [0, 0, 1, 1], [], []>} : vector<4x128xf32>, vector<128x128xf32>, vector<4x128xf32> -> vector<4x128xf32>
    %c0_9 = arith.constant 0 : index
    %c0_10 = arith.constant 0 : index
    %10 = vector.load %arg5[%c0_9, %c0_10] : memref<1x128xf32, #tpu.memory_space<vmem>>, vector<1x128xf32>
    %11 = vector.broadcast %10 : vector<1x128xf32> to vector<4x128xf32>
    %12 = arith.addf %9, %11 : vector<4x128xf32>
    %cst_11 = arith.constant 0.000000e+00 : f32
    %13 = vector.broadcast %cst_11 : f32 to vector<4x128xf32>
    %14 = arith.maximumf %12, %13 : vector<4x128xf32>
    %c0_12 = arith.constant 0 : index
    %c0_13 = arith.constant 0 : index
    %15 = vector.load %arg6[%c0_12, %c0_13] : memref<128x128xf32, #tpu.memory_space<vmem>>, vector<128x128xf32>
    %cst_14 = arith.constant dense<0.000000e+00> : vector<4x128xf32>
    %16 = tpu.matmul %14, %15, %cst_14 {dimension_numbers = #tpu.dot_dimension_numbers<[1], [0], [0], [1], [0, 0, 1, 1], [], []>} : vector<4x128xf32>, vector<128x128xf32>, vector<4x128xf32> -> vector<4x128xf32>
    %c0_15 = arith.constant 0 : index
    %c0_16 = arith.constant 0 : index
    %17 = vector.load %arg7[%c0_15, %c0_16] : memref<1x128xf32, #tpu.memory_space<vmem>>, vector<1x128xf32>
    %18 = vector.broadcast %17 : vector<1x128xf32> to vector<4x128xf32>
    %19 = arith.addf %16, %18 : vector<4x128xf32>
    %20 = vector.extract_strided_slice %19 {offsets = [0, 0], sizes = [4, 5], strides = [1, 1]} : vector<4x128xf32> to vector<4x5xf32>
    %c0_17 = arith.constant 0 : index
    %c0_18 = arith.constant 0 : index
    %21 = vector.load %arg8[%c0_17, %c0_18] : memref<4x5xf32, #tpu.memory_space<vmem>>, vector<4x5xf32>
    tpu.vector_store %arg8[%c0_17, %c0_18], %20 {strides = array<i32>} : memref<4x5xf32, #tpu.memory_space<vmem>>, vector<4x5xf32>,
    return
  }
  func.func @transform_0(%arg0: i32) -> (i32, i32) {
    %c0_i32 = arith.constant 0 : i32
    %c0_i32_0 = arith.constant 0 : i32
    return %arg0, %c0_i32 : i32, i32
  }
  func.func @transform_1(%arg0: i32) -> (i32, i32) {
    %c0_i32 = arith.constant 0 : i32
    %c0_i32_0 = arith.constant 0 : i32
    %c0_i32_1 = arith.constant 0 : i32
    return %c0_i32, %c0_i32_0 : i32, i32
  }
  func.func @transform_2(%arg0: i32) -> (i32, i32) {
    %c0_i32 = arith.constant 0 : i32
    %c0_i32_0 = arith.constant 0 : i32
    %c0_i32_1 = arith.constant 0 : i32
    return %c0_i32, %c0_i32_0 : i32, i32
  }
  func.func @transform_3(%arg0: i32) -> (i32, i32) {
    %c0_i32 = arith.constant 0 : i32
    %c0_i32_0 = arith.constant 0 : i32
    %c0_i32_1 = arith.constant 0 : i32
    return %c0_i32, %c0_i32_0 : i32, i32
  }
  func.func @transform_4(%arg0: i32) -> (i32, i32) {
    %c0_i32 = arith.constant 0 : i32
    %c0_i32_0 = arith.constant 0 : i32
    %c0_i32_1 = arith.constant 0 : i32
    return %c0_i32, %c0_i32_0 : i32, i32
  }
  func.func @transform_5(%arg0: i32) -> (i32, i32) {
    %c0_i32 = arith.constant 0 : i32
    %c0_i32_0 = arith.constant 0 : i32
    %c0_i32_1 = arith.constant 0 : i32
    return %c0_i32, %c0_i32_0 : i32, i32
  }
  func.func @transform_6(%arg0: i32) -> (i32, i32) {
    %c0_i32 = arith.constant 0 : i32
    %c0_i32_0 = arith.constant 0 : i32
    %c0_i32_1 = arith.constant 0 : i32
    return %c0_i32, %c0_i32_0 : i32, i32
  }
  func.func @transform_7(%arg0: i32) -> (i32, i32) {
    %c0_i32 = arith.constant 0 : i32
    %c0_i32_0 = arith.constant 0 : i32
    return %arg0, %c0_i32 : i32, i32
  }
}

</mosaic_0001>

<bundles_post_ra>
// kernel: tpu_custom_call.1
= control target key start
LH: loop header
LB: loop body
LE: loop exit
PB: predicated region body
PF: predicated region fallthrough
CT: control target
= control target key end

     0   :  { %12 = vsyncpa [#allocation3], 0  ;;  %s712_s0 = inlined_call_operand.hbm [shape: f32[4,8], index: 0, kind: input, shape index: {}]   ;;  %s713_s1 = inlined_call_operand.hbm [shape: f32[8,128], index: 1, kind: input, shape index: {}]   ;;  %s714_s2 = inlined_call_operand.vmem [shape: f32[1,128], index: 2, kind: input, shape index: {}]   ;;  %s715_s3 = inlined_call_operand.hbm [shape: f32[128,128], index: 3, kind: input, shape index: {}]   ;;  %s716_s4 = inlined_call_operand.vmem [shape: f32[1,128], index: 4, kind: input, shape index: {}]   ;;  %s717_s5 = inlined_call_operand.hbm [shape: f32[128,128], index: 5, kind: input, shape index: {}]   ;;  %s718_s6 = inlined_call_operand.vmem [shape: f32[1,128], index: 6, kind: input, shape index: {}]   ;;  %s719_s7 = inlined_call_operand.hbm [shape: f32[4,5], index: 7, kind: output, shape index: {}]  }
   0x1   :  { %13 = vsyncpa [#allocation6], 0 }
   0x2   :  { %14 = vsyncpa [#allocation9], 0 }
   0x3   :  { %15 = vsyncpa [#allocation4], 0  ;;  %s600_s24 = smov [#allocation5]   ;;  %s601_s26 = smov [#allocation2]  }
   0x4   :  { %s32_s25 = sshll.u32 %s600_s24, 4  ;;  %s22_s27 = sshll.u32 %s601_s26, 4  ;;  %s33_s25 = int_to_ptr.vmem [resolvable:$true] %s32_s25  ;;  %s23_s27 = int_to_ptr.vmem [resolvable:$true] %s22_s27 }
   0x5   :  { %s500_s28 = scalar_lea.vmem %s33_s25, 128  ;;  %p505_p1 = scmp.lt.s32.totalorder %s33_s25, %s33_s25 }
   0x6   :  { %p501_p0 = scmp.ne.s32.totalorder %s33_s25, %s500_s28  ;;  %p506_p2 = scmp.lt.s32.totalorder %s500_s28, %s500_s28 }
   0x8   :  { %p507_p3 = por %p506_p2, %p505_p1 }
   0xa   :  { %p508_p4 = pnand %p507_p3, %p501_p0 }
   0xc   :  { %511 = shalt.err (!%p508_p4)
}
   0xd   :  { %35 = dma.hbm_to_vmem [thread:$0]  %s713_s1, 128, %s33_s25, [#allocation6]  }
   0xe   :  { %s520_s8 = scalar_lea.vmem %s23_s27, 64  ;;  %p525_p6 = scmp.lt.s32.totalorder %s23_s27, %s23_s27 }
   0xf   :  { %p521_p5 = scmp.ne.s32.totalorder %s23_s27, %s520_s8  ;;  %p526_p7 = scmp.lt.s32.totalorder %s520_s8, %s520_s8 }
  0x11   :  { %p527_p8 = por %p526_p7, %p525_p6 }
  0x13   :  { %p528_p9 = pnand %p527_p8, %p521_p5 }
  0x15   :  { %531 = shalt.err (!%p528_p9)
}
  0x16   :  { %25 = dma.hbm_to_vmem [thread:$0]  %s712_s0, 64, %s23_s27, [#allocation3]  }
  0x17   :  { %s602_s11 = smov [#allocation7]  }
  0x18   :  { %s43_s12 = sshll.u32 %s602_s11, 4  ;;  %s44_s12 = int_to_ptr.vmem [resolvable:$true] %s43_s12 }
  0x19   :  { %s540_s13 = scalar_lea.vmem %s44_s12, 2048  ;;  %p545_p11 = scmp.lt.s32.totalorder %s44_s12, %s44_s12 }
  0x1a   :  { %p541_p10 = scmp.ne.s32.totalorder %s44_s12, %s540_s13  ;;  %p546_p12 = scmp.lt.s32.totalorder %s540_s13, %s540_s13 }
  0x1c   :  { %p547_p13 = por %p546_p12, %p545_p11 }
  0x1e   :  { %p548_p0 = pnand %p547_p13, %p541_p10 }
  0x20   :  { %551 = shalt.err (!%p548_p0)
}
  0x21   :  { %s603_s1 = smov 128   ;;  %s604_s14 = smov 8  }
  0x22   :  { %49 = dma.hbm_to_vmem [thread:$0]  %s715_s3, 2048, %s44_s12, [#allocation6], %s603_s1, %s603_s1, %s604_s14  }
  0x23   :  { %s605_s17 = smov [#allocation8]  }
  0x24   :  { %s57_s18 = sshll.u32 %s605_s17, 4  ;;  %s58_s18 = int_to_ptr.vmem [resolvable:$true] %s57_s18 }
  0x25   :  { %s560_s0 = scalar_lea.vmem %s58_s18, 2048  ;;  %p565_p2 = scmp.lt.s32.totalorder %s58_s18, %s58_s18 }
  0x26   :  { %p561_p1 = scmp.ne.s32.totalorder %s58_s18, %s560_s0  ;;  %p566_p3 = scmp.lt.s32.totalorder %s560_s0, %s560_s0 }
  0x28   :  { %p567_p4 = por %p566_p3, %p565_p2 }
  0x2a   :  { %p568_p5 = pnand %p567_p4, %p561_p1 }
  0x2c   :  { %571 = shalt.err (!%p568_p5)
}
  0x2d   :  { %63 = dma.hbm_to_vmem [thread:$0]  %s717_s5, 2048, %s58_s18, [#allocation9], %s603_s1, %s603_s1, %s604_s14  }
  0x2e   :  { %592 = dma.done.wait [#allocation3], 64  }
  0x2f   :  { %593 = vsyncadd [#allocation3], 4294967232 }
  0x30   :  { %594 = dma.done.wait [#allocation6], 2176  }
  0x31   :  { %595 = vsyncadd [#allocation6], 4294965120 }
  0x32   :  { %596 = dma.done.wait [#allocation9], 2048  }
  0x33   :  { %597 = vsyncadd [#allocation9], 4294965248  ;;  %v606_v0 = vmov 0.0   ;;  %vm607_vm0 = vmmov 0   ;;  %vm87_vm1 = vcmask 64512   ;;  %v79_v1 = vld [vmem:[#allocation5] sm:$0xff] }
  0x34   :  { %408 = vmatprep.subr.mxu0 %v606_v0  ;;  %410 = vmatprep.mubr.msk.f32.mxu0 %vm607_vm0, %v606_v0  ;;  %v78_v2 = vld [vmem:[#allocation2] sm:$0xf]  ;;  %v177_v3 = vld [vmem:[#allocation7 + $0x78] sm:$0xff]  ;;  %v175_v5 = vld [vmem:[#allocation7 + $0x68] sm:$0xff]  ;;  %s608_s24 = smov [#allocation10]   ;;  %vm349_vm2 = vcmask 35840  }
  0x35   :  { %413 = vmatprep.subr.mxu1 %v606_v0  ;;  %445 = vmatprep.mubr.msk.f32.mxu1 %vm607_vm0, %v606_v0  ;;  %v176_v4 = vld [vmem:[#allocation7 + $0x70] sm:$0xff]  ;;  %v174_v6 = vld [vmem:[#allocation7 + $0x60] sm:$0xff]  ;;  %v173_v7 = vld [vmem:[#allocation7 + $0x58] sm:$0xff]  ;;  %s357_s25 = sshll.u32 %s608_s24, 4  ;;  %s358_s25 = int_to_ptr.vmem [resolvable:$true] %s357_s25 }
  0x36   :  { %409 = vmatpush3.msra.mxu0 %v79_v1  ;;  %414 = vmatpush3.msra.mxu1 %v177_v3  ;;  %v172_v8 = vld [vmem:[#allocation7 + $0x50] sm:$0xff]  ;;  %v171_v9 = vld [vmem:[#allocation7 + $0x48] sm:$0xff]  ;;  %v170_v10 = vld [vmem:[#allocation7 + $0x40] sm:$0xff]  ;;  %s572_s26 = scalar_lea.vmem %s358_s25, 64  ;;  %p577_p7 = scmp.lt.s32.totalorder %s358_s25, %s358_s25 }
  0x37   :  { %411 = vmatmul.mubr.msk.f32.vlgmr.msra.gmra.mxu0 %vm87_vm1, %v78_v2  ;;  %415 = vmatprep.subr.mxu1 %v606_v0  ;;  %v169_v11 = vld [vmem:[#allocation7 + $0x38] sm:$0xff]  ;;  %v168_v12 = vld [vmem:[#allocation7 + $0x30] sm:$0xff]  ;;  %v167_v13 = vld [vmem:[#allocation7 + $0x28] sm:$0xff]  ;;  %p573_p6 = scmp.ne.s32.totalorder %s358_s25, %s572_s26  ;;  %p578_p8 = scmp.lt.s32.totalorder %s572_s26, %s572_s26 }
  0x38   :  { %416 = vmatpush3.msra.mxu1 %v176_v4  ;;  %448 = vmatprep.subr.mxu0 %v606_v0  ;;  %v166_v14 = vld [vmem:[#allocation7 + $0x20] sm:$0xff]  ;;  %v165_v15 = vld [vmem:[#allocation7 + $0x18] sm:$0xff]  ;;  %v164_v16 = vld [vmem:[#allocation7 + $0x10] sm:$0xff] }
  0x39   :  { %417 = vmatprep.subr.mxu1 %v606_v0  ;;  %480 = vmatprep.mubr.msk.f32.mxu0 %vm607_vm0, %v606_v0  ;;  %v163_v17 = vld [vmem:[#allocation7 + $0x8] sm:$0xff]  ;;  %v162_v18 = vld [vmem:[#allocation7] sm:$0xff]  ;;  %v271_v19 = vld [vmem:[#allocation8 + $0x78] sm:$0xff]  ;;  %p579_p9 = por %p578_p8, %p577_p7 }
  0x3a   :  { %418 = vmatpush3.msra.mxu1 %v175_v5  ;;  %v270_v20 = vld [vmem:[#allocation8 + $0x70] sm:$0xff]  ;;  %449 = vmatpush3.msra.mxu0 %v271_v19  ;;  %v269_v21 = vld [vmem:[#allocation8 + $0x68] sm:$0xff]  ;;  %v268_v22 = vld [vmem:[#allocation8 + $0x60] sm:$0xff] }
  0x3b   :  { %419 = vmatprep.subr.mxu1 %v606_v0  ;;  %450 = vmatprep.subr.mxu0 %v606_v0  ;;  %v267_v23 = vld [vmem:[#allocation8 + $0x58] sm:$0xff]  ;;  %v266_v24 = vld [vmem:[#allocation8 + $0x50] sm:$0xff]  ;;  %v265_v25 = vld [vmem:[#allocation8 + $0x48] sm:$0xff]  ;;  %p580_p10 = pnand %p579_p9, %p573_p6 }
  0x3c   :  { %420 = vmatpush3.msra.mxu1 %v174_v6  ;;  %451 = vmatpush3.msra.mxu0 %v270_v20  ;;  %v264_v26 = vld [vmem:[#allocation8 + $0x40] sm:$0xff]  ;;  %v263_v27 = vld [vmem:[#allocation8 + $0x38] sm:$0xff]  ;;  %v262_v28 = vld [vmem:[#allocation8 + $0x30] sm:$0xff] }
  0x3d   :  { %421 = vmatprep.subr.mxu1 %v606_v0  ;;  %452 = vmatprep.subr.mxu0 %v606_v0  ;;  %v261_v29 = vld [vmem:[#allocation8 + $0x28] sm:$0xff]  ;;  %v260_v30 = vld [vmem:[#allocation8 + $0x20] sm:$0xff]  ;;  %v259_v31 = vld [vmem:[#allocation8 + $0x18] sm:$0xff] }
  0x3e   :  { %422 = vmatpush3.msra.mxu1 %v173_v7  ;;  %453 = vmatpush3.msra.mxu0 %v269_v21  ;;  %v368_v32 = vld [vmem:[%s714_s2] ss:$0 sm:$0xff]  ;;  %v257_v38 = vld [vmem:[#allocation8 + $0x8] sm:$0xff]  ;;  %v256_v39 = vld [vmem:[#allocation8] sm:$0xff] }
  0x3f   :  { %423 = vmatprep.subr.mxu1 %v606_v0  ;;  %454 = vmatprep.subr.mxu0 %v606_v0  ;;  %v258_v37 = vld [vmem:[#allocation8 + $0x10] sm:$0xff] }
  0x40   :  { %424 = vmatpush3.msra.mxu1 %v172_v8  ;;  %455 = vmatpush3.msra.mxu0 %v268_v22  ;;  %v370_v40 = vld [vmem:[%s716_s4] ss:$0 sm:$0xff] }
  0x41   :  { %425 = vmatprep.subr.mxu1 %v606_v0  ;;  %456 = vmatprep.subr.mxu0 %v606_v0  ;;  %v371_v45 = vld [vmem:[%s718_s6] ss:$0 sm:$0xff] }
  0x42   :  { %426 = vmatpush3.msra.mxu1 %v171_v9  ;;  %457 = vmatpush3.msra.mxu0 %v267_v23 }
  0x43   :  { %427 = vmatprep.subr.mxu1 %v606_v0  ;;  %458 = vmatprep.subr.mxu0 %v606_v0 }
  0x44   :  { %428 = vmatpush3.msra.mxu1 %v170_v10  ;;  %459 = vmatpush3.msra.mxu0 %v266_v24 }
  0x45   :  { %429 = vmatprep.subr.mxu1 %v606_v0  ;;  %460 = vmatprep.subr.mxu0 %v606_v0 }
  0x46   :  { %430 = vmatpush3.msra.mxu1 %v169_v11  ;;  %461 = vmatpush3.msra.mxu0 %v265_v25 }
  0x47   :  { %431 = vmatprep.subr.mxu1 %v606_v0  ;;  %462 = vmatprep.subr.mxu0 %v606_v0 }
  0x48   :  { %432 = vmatpush3.msra.mxu1 %v168_v12  ;;  %463 = vmatpush3.msra.mxu0 %v264_v26 }
  0x49   :  { %433 = vmatprep.subr.mxu1 %v606_v0  ;;  %464 = vmatprep.subr.mxu0 %v606_v0 }
  0x4a   :  { %434 = vmatpush3.msra.mxu1 %v167_v13  ;;  %465 = vmatpush3.msra.mxu0 %v263_v27 }
  0x4b   :  { %435 = vmatprep.subr.mxu1 %v606_v0  ;;  %466 = vmatprep.subr.mxu0 %v606_v0 }
  0x4c   :  { %436 = vmatpush3.msra.mxu1 %v166_v14  ;;  %467 = vmatpush3.msra.mxu0 %v262_v28 }
  0x4d   :  { %437 = vmatprep.subr.mxu1 %v606_v0  ;;  %468 = vmatprep.subr.mxu0 %v606_v0 }
  0x4e   :  { %438 = vmatpush3.msra.mxu1 %v165_v15  ;;  %469 = vmatpush3.msra.mxu0 %v261_v29 }
  0x4f   :  { %439 = vmatprep.subr.mxu1 %v606_v0  ;;  %470 = vmatprep.subr.mxu0 %v606_v0 }
  0x50   :  { %440 = vmatpush3.msra.mxu1 %v164_v16  ;;  %471 = vmatpush3.msra.mxu0 %v260_v30 }
  0x51   :  { %441 = vmatprep.subr.mxu1 %v606_v0  ;;  %472 = vmatprep.subr.mxu0 %v606_v0 }
  0x52   :  { %442 = vmatpush3.msra.mxu1 %v163_v17  ;;  %473 = vmatpush3.msra.mxu0 %v259_v31 }
  0x53   :  { %443 = vmatprep.subr.mxu1 %v606_v0  ;;  %474 = vmatprep.subr.mxu0 %v606_v0 }
  0x54   :  { %444 = vmatpush3.msra.mxu1 %v162_v18  ;;  %475 = vmatpush3.msra.mxu0 %v258_v37 }
  0x55   :  { %476 = vmatprep.subr.mxu0 %v606_v0 }
  0x56   :  { %477 = vmatpush3.msra.mxu0 %v257_v38 }
  0x57   :  { %478 = vmatprep.subr.mxu0 %v606_v0 }
  0x58   :  { %479 = vmatpush3.msra.mxu0 %v256_v39 }
  0xf7   :  { %v157_v33 = vpop.f32.mrf.mxu0 }
  0xf8   :  { %v158_v34 = vadd.f32 %v368_v32, %v157_v33 }
  0xf9   :  { %v412_v35 = vpop.f32.mrf.mxu0 }
  0xfa   :  { %v161_v36 = vmax.f32 %v158_v34, 0.0 }
  0xfc   :  { %446 = vmatmul.mubr.f32.vlgmr.msra.gmra.mxu1 %v161_v36 }
 0x1bc   :  { %v251_v41 = vpop.f32.mrf.mxu1 }
 0x1bd   :  { %v252_v42 = vadd.f32 %v370_v40, %v251_v41 }
 0x1be   :  { %v447_v43 = vpop.f32.mrf.mxu1 }
 0x1bf   :  { %v255_v44 = vmax.f32 %v252_v42, 0.0 }
 0x1c1   :  { %481 = vmatmul.mubr.f32.vlgmr.msra.gmra.mxu0 %v255_v44 }
 0x281   :  { %v345_v46 = vpop.f32.mrf.mxu0 }
 0x282   :  { %v346_v47 = vadd.f32 %v371_v45, %v345_v46 }
 0x283   :  { %v482_v48 = vpop.f32.mrf.mxu0 }
 0x284   :  { %350 = vst.msk [vmem:[#allocation10] sm:$0xf] %vm349_vm2, %v346_v47 }
 0x285   :  { %583 = shalt.err (!%p580_p10)
}
 0x286   :  { %360 = dma.vmem_to_hbm [thread:$0]  %s358_s25, 64, %s719_s7, [#allocation4]  }
 0x287   :  { %598 = dma.done.wait [#allocation4], 64  }
 0x288   :  { %599 = vsyncadd [#allocation4], 4294967232 }
 0x289   :  { %364 = vsyncpa [#allocation3], 1 }
 0x28a   :  { %365 = vsyncpa [#allocation6], 1 }
 0x28b   :  { %366 = vsyncpa [#allocation9], 1 }
 0x28c   :  { %367 = vsyncpa [#allocation4], 1 }

</bundles_post_ra>
